<compile_context>
chip_gen: v6e
topology: v6e:2x2x1
jax: 0.10.0
libtpu: 0.0.40
codegen_flags: <defaults>
</compile_context>

<pallas_src>
import functools

import jax
import jax.numpy as jnp
from jax.experimental import pallas as pl
from jax.experimental.pallas import tpu as pltpu


_ACTIVATIONS = {
    "tanh": jnp.tanh,
    "relu": lambda y: jnp.maximum(y, 0.0),
    "sigmoid": jax.nn.sigmoid,
    "leaky_relu": lambda y: jnp.where(y >= 0.0, y, 0.01 * y),  # torch default slope
}


def _round_up(v, m):
    return ((v + m - 1) // m) * m


def _largest_divisor(dim, candidates):
    for c in candidates:
        if c <= dim and dim % c == 0:
            return c
    return None


def _pad_and_tile(dim, candidates):
    """Return (padded_dim, tile) with tile | padded_dim and tile a 128-multiple."""
    t = _largest_divisor(dim, candidates)
    if t is not None:
        return dim, t
    dim_p = _round_up(dim, 128)
    t = _largest_divisor(dim_p, candidates)
    return dim_p, (t if t is not None else 128)


def _vmem_capacity_bytes():
    try:
        cap = int(pltpu.get_tpu_info().vmem_capacity_bytes)
        if cap > 0:
            return cap
    except Exception:
        pass
    return 64 << 20  # conservative: v7x per-TensorCore VMEM


# ------------------------------ kernels ------------------------------------------


def _kernel_fused_f32(x_ref, r_ref, w_ref, s_ref, o_ref, *, k_axis, act_fn):
    """f32 output: accumulate straight into the K-resident output block."""
    k = pl.program_id(k_axis)
    nk = pl.num_programs(k_axis)

    xr = (x_ref[...].astype(jnp.float32) * r_ref[...].astype(jnp.float32)
          ).astype(w_ref.dtype)
    part = jnp.dot(xr, w_ref[...], preferred_element_type=jnp.float32)

    @pl.when(k == 0)
    def _():
        o_ref[...] = part

    @pl.when(k != 0)
    def _():
        o_ref[...] += part

    @pl.when(k == nk - 1)
    def _():
        o_ref[...] = act_fn(o_ref[...] * s_ref[...].astype(jnp.float32)
                            ).astype(o_ref.dtype)


def _kernel_fused_acc(x_ref, r_ref, w_ref, s_ref, o_ref, acc_ref, *, k_axis, act_fn):
    """Generic (e.g. bf16) output: f32 VMEM accumulator scratch."""
    k = pl.program_id(k_axis)
    nk = pl.num_programs(k_axis)

    @pl.when(k == 0)
    def _():
        acc_ref[...] = jnp.zeros_like(acc_ref)

    xr = (x_ref[...].astype(jnp.float32) * r_ref[...].astype(jnp.float32)
          ).astype(w_ref.dtype)
    acc_ref[...] += jnp.dot(xr, w_ref[...], preferred_element_type=jnp.float32)

    @pl.when(k == nk - 1)
    def _():
        o_ref[...] = act_fn(acc_ref[...] * s_ref[...].astype(jnp.float32)
                            ).astype(o_ref.dtype)


# ------------------------------ wrapper -------------------------------------------


def linear_layer_forward(x, r, s, weight, activation_fun="tanh",
                         compute_dtype=jnp.bfloat16, allow_resident_w=True):
    """x: [B, in_c]; r: [R, in_c]; s: [R, out_c]; weight: [out_c, in_c] (torch layout)."""
    B, in_c = x.shape
    R, r_in = r.shape
    out_c, w_in = weight.shape
    if r_in != in_c or w_in != in_c or s.shape != (R, out_c):
        raise ValueError("inconsistent LinearLayer parameter shapes")
    if B % R != 0:
        raise ValueError(f"batch {B} must be divisible by representations_number {R}")
    repeats = B // R

    act_fn = _ACTIVATIONS.get(activation_fun, jnp.tanh)  # module defaults to Tanh
    out_dtype = x.dtype
    fuse_acc_into_out = (out_dtype == jnp.float32)

    x_isz = jnp.dtype(x.dtype).itemsize
    o_isz = jnp.dtype(out_dtype).itemsize
    c_isz = jnp.dtype(compute_dtype).itemsize

    vmem_budget = max(int(0.70 * _vmem_capacity_bytes()), 16 << 20)

    # ---------------- M tiling / path selection ----------------
    per_rep = (repeats % 128 == 0)   # large repeats -> tiny r/s tables, no r_rep in HBM
    if per_rep:
        tm = _largest_divisor(repeats, (512, 256, 128))
        B_p = B
        r_rows = 1
    else:
        tm = _largest_divisor(B, (512, 256, 128, 64, 32, 16, 8))
        if tm is None:
            tm = 256 if B > 256 else _round_up(B, 8)
        B_p = _round_up(B, tm)
        r_rows = tm

    def _need(tk, tn, w_elems):
        n = (2 * tm * tk * x_isz          # x tiles (double-buffered)
             + 2 * r_rows * tk * 4        # r blocks (f32)
             + 2 * w_elems * c_isz        # W buffers
             + 2 * r_rows * tn * 4        # s blocks
             + 2 * tm * tn * o_isz)       # out tiles
        if not fuse_acc_into_out:
            n += tm * tn * 4              # f32 accumulator scratch
        return n

    # ---------------- K/N tiling: resident W if it fits ----------------
    resident_w = allow_resident_w and _need(in_c, out_c, in_c * out_c) <= vmem_budget
    if resident_w:
        in_c_p, out_c_p, tk, tn = in_c, out_c, in_c, out_c
    else:
        in_c_p, tk = _pad_and_tile(in_c, (2048, 1024, 512, 256, 128))
        out_c_p, tn = _pad_and_tile(out_c, (512, 256, 128))
        while _need(tk, tn, tk * tn) > vmem_budget and tk > 128:
            tk //= 2
        while _need(tk, tn, tk * tn) > vmem_budget and tn > 128:
            tn //= 2
    w_block = (in_c_p, out_c_p) if resident_w else (tk, tn)

    # ---------------- operand layout / padding ----------------
    w_t = weight.T
    if (in_c_p, out_c_p) != (in_c, out_c):
        w_t = jnp.pad(w_t, ((0, in_c_p - in_c), (0, out_c_p - out_c)))
    w_t = w_t.astype(compute_dtype)                    # [in_c_p, out_c_p] for the MXU

    x_p = x if in_c_p == in_c else jnp.pad(x, ((0, 0), (0, in_c_p - in_c)))
    r32 = r.astype(jnp.float32)
    s32 = s.astype(jnp.float32)
    if in_c_p != in_c:
        r32 = jnp.pad(r32, ((0, 0), (0, in_c_p - in_c)))
    if out_c_p != out_c:
        s32 = jnp.pad(s32, ((0, 0), (0, out_c_p - out_c)))

    if per_rep:
        x_arr = x_p.reshape(R, repeats, in_c_p)
        r_arr = r32.reshape(R, 1, in_c_p)
        s_arr = s32.reshape(R, 1, out_c_p)
        grid = (R, repeats // tm, out_c_p // tn, in_c_p // tk)
        k_axis = 3
        in_specs = [
            pl.BlockSpec((None, tm, tk), lambda rr, mi, n, k: (rr, mi, k)),   # x tile
            pl.BlockSpec((None, 1, tk), lambda rr, mi, n, k: (rr, 0, k)),     # r row chunk
            pl.BlockSpec(w_block, lambda rr, mi, n, k: (k, n)),               # W (resident -> (0,0))
            pl.BlockSpec((None, 1, tn), lambda rr, mi, n, k: (rr, 0, n)),     # s row chunk
        ]
        out_spec = pl.BlockSpec((None, tm, tn), lambda rr, mi, n, k: (rr, mi, n))
        out_struct = jax.ShapeDtypeStruct((R, repeats, out_c_p), out_dtype)
        dim_sem = ("parallel", "parallel", "parallel", "arbitrary")
    else:
        x_arr = x_p if B_p == B else jnp.pad(x_p, ((0, B_p - B), (0, 0)))
        r_arr = jnp.repeat(r32, repeats, axis=0)       # [B, in_c_p]
        s_arr = jnp.repeat(s32, repeats, axis=0)       # [B, out_c_p]
        if B_p != B:
            r_arr = jnp.pad(r_arr, ((0, B_p - B), (0, 0)))
            s_arr = jnp.pad(s_arr, ((0, B_p - B), (0, 0)))
        grid = (B_p // tm, out_c_p // tn, in_c_p // tk)
        k_axis = 2
        in_specs = [
            pl.BlockSpec((tm, tk), lambda m, n, k: (m, k)),                   # x tile
            pl.BlockSpec((tm, tk), lambda m, n, k: (m, k)),                   # r_rep tile
            pl.BlockSpec(w_block, lambda m, n, k: (k, n)),                    # W (resident -> (0,0))
            pl.BlockSpec((tm, tn), lambda m, n, k: (m, n)),                   # s_rep tile
        ]
        out_spec = pl.BlockSpec((tm, tn), lambda m, n, k: (m, n))
        out_struct = jax.ShapeDtypeStruct((B_p, out_c_p), out_dtype)
        dim_sem = ("parallel", "parallel", "arbitrary")

    if fuse_acc_into_out:
        kernel = functools.partial(_kernel_fused_f32, k_axis=k_axis, act_fn=act_fn)
        scratch_shapes = ()
    else:
        kernel = functools.partial(_kernel_fused_acc, k_axis=k_axis, act_fn=act_fn)
        scratch_shapes = (pltpu.VMEM((tm, tn), jnp.float32),)

    out = pl.pallas_call(
        kernel,
        out_shape=out_struct,
        grid_spec=pltpu.PrefetchScalarGridSpec(
            num_scalar_prefetch=0,
            grid=grid,
            in_specs=in_specs,
            out_specs=out_spec,
            scratch_shapes=scratch_shapes,
        ),
        compiler_params=pltpu.CompilerParams(
            dimension_semantics=dim_sem,
            vmem_limit_bytes=int(vmem_budget),
        ),
    )(x_arr, r_arr, w_t, s_arr)

    if per_rep:
        out = out.reshape(B, out_c_p)
    if out.shape != (B, out_c):
        out = out[:B, :out_c]
    return out


# ------------------------------ reference ------------------------------------------


def reference_forward(x, r, s, weight, activation_fun="tanh", matmul_dtype=None):
    """Pure-JAX reference mirroring the torch module (optionally bf16-matched matmul)."""
    B = x.shape[0]
    R = r.shape[0]
    repeats = B // R
    r_rep = jnp.repeat(r.astype(jnp.float32), repeats, axis=0)
    s_rep = jnp.repeat(s.astype(jnp.float32), repeats, axis=0)
    xr = x.astype(jnp.float32) * r_rep
    w_t = weight.T
    if matmul_dtype is None:
        y = jnp.dot(xr, w_t.astype(jnp.float32),
                    preferred_element_type=jnp.float32,
                    precision=jax.lax.Precision.HIGHEST)
    else:
        y = jnp.dot(xr.astype(matmul_dtype), w_t.astype(matmul_dtype),
                    preferred_element_type=jnp.float32)
    y = y * s_rep
    act = _ACTIVATIONS.get(activation_fun, jnp.tanh)
    return act(y).astype(x.dtype)


if __name__ == "__main__":
    keys = jax.random.split(jax.random.PRNGKey(0), 20)

    def make_inputs(kbase, B, in_c, out_c, R, x_dtype=jnp.float32):
        x = jax.random.normal(keys[kbase], (B, in_c), dtype=jnp.float32).astype(x_dtype)
        r = jax.random.normal(keys[kbase + 1], (R, in_c), dtype=jnp.float32)      # self.r
        s = jax.random.normal(keys[kbase + 2], (R, out_c), dtype=jnp.float32)     # self.s
        bound = 1.0 / float(in_c) ** 0.5
        w = jax.random.uniform(keys[kbase + 3], (out_c, in_c), dtype=jnp.float32,
                               minval=-bound, maxval=bound)                        # nn.Linear
        return x, r, s, w

    # --- case 1: toy module shapes, general path + resident W, tanh ---
    x1, r1, s1, w1 = make_inputs(0, B=8, in_c=32, out_c=64, R=4)
    out1 = jax.block_until_ready(linear_layer_forward(x1, r1, s1, w1, "tanh"))
    assert out1.shape == (8, 64)
    assert jnp.allclose(out1, reference_forward(x1, r1, s1, w1, "tanh",
                                                matmul_dtype=jnp.bfloat16),
                        atol=2e-3, rtol=2e-3)
    assert jnp.allclose(out1, reference_forward(x1, r1, s1, w1, "tanh"),
                        atol=5e-2, rtol=5e-2)

    # --- case 2: per-rep path (repeats=128), resident W, sigmoid ---
    x2, r2, s2, w2 = make_inputs(4, B=256, in_c=128, out_c=128, R=2)
    out2 = jax.block_until_ready(linear_layer_forward(x2, r2, s2, w2, "sigmoid"))
    assert out2.shape == (256, 128)
    assert jnp.allclose(out2, reference_forward(x2, r2, s2, w2, "sigmoid",
                                                matmul_dtype=jnp.bfloat16),
                        atol=2e-3, rtol=2e-3)

    # --- case 3: streamed-W fallback (3 K tiles, 3 N tiles), relu ---
    x3, r3, s3, w3 = make_inputs(8, B=96, in_c=384, out_c=384, R=4)
    out3 = jax.block_until_ready(
        linear_layer_forward(x3, r3, s3, w3, "relu", allow_resident_w=False))
    assert out3.shape == (96, 384)
    assert jnp.allclose(out3, reference_forward(x3, r3, s3, w3, "relu",
                                                matmul_dtype=jnp.bfloat16),
                        atol=2e-3, rtol=2e-3)

    # --- case 4: bf16 input/output (f32 accumulator scratch path), leaky_relu ---
    x4, r4, s4, w4 = make_inputs(12, B=16, in_c=64, out_c=128, R=4, x_dtype=jnp.bfloat16)
    out4 = jax.block_until_ready(linear_layer_forward(x4, r4, s4, w4, "leaky_relu"))
    assert out4.shape == (16, 128) and out4.dtype == jnp.bfloat16
    ref4 = reference_forward(x4, r4, s4, w4, "leaky_relu", matmul_dtype=jnp.bfloat16)
    assert jnp.allclose(out4.astype(jnp.float32), ref4.astype(jnp.float32),
                        atol=5e-2, rtol=5e-2)

    print("KERNEL_OK")
</pallas_src>

<mosaic_0001>
module attributes {stable_mosaic.version = 11 : i64} {
  func.func @_kernel_fused_f32(%arg0: i32, %arg1: i32, %arg2: i32, %arg3: memref<8x32xf32, #tpu.memory_space<vmem>>, %arg4: memref<8x32xf32, #tpu.memory_space<vmem>>, %arg5: memref<32x64xbf16, #tpu.memory_space<vmem>>, %arg6: memref<8x64xf32, #tpu.memory_space<vmem>>, %arg7: memref<8x64xf32, #tpu.memory_space<vmem>>) attributes {dimension_semantics = [#tpu.dimension_semantics<parallel>, #tpu.dimension_semantics<parallel>, #tpu.dimension_semantics<arbitrary>], iteration_bounds = array<i64: 1, 1, 1>, scalar_prefetch = 0 : i64, scratch_operands = 0 : i64, tpu.core_type = #tpu.core_type<tc>, window_params = [{transform_indices = @transform_0, window_bounds = array<i64: 8, 32>}, {transform_indices = @transform_1, window_bounds = array<i64: 8, 32>}, {transform_indices = @transform_2, window_bounds = array<i64: 32, 64>}, {transform_indices = @transform_3, window_bounds = array<i64: 8, 64>}, {transform_indices = @transform_4, window_bounds = array<i64: 8, 64>}]} {
    %c0 = arith.constant 0 : index
    %c0_0 = arith.constant 0 : index
    %0 = vector.load %arg3[%c0, %c0_0] : memref<8x32xf32, #tpu.memory_space<vmem>>, vector<8x32xf32>
    %c0_1 = arith.constant 0 : index
    %c0_2 = arith.constant 0 : index
    %1 = vector.load %arg4[%c0_1, %c0_2] : memref<8x32xf32, #tpu.memory_space<vmem>>, vector<8x32xf32>
    %2 = arith.mulf %0, %1 : vector<8x32xf32>
    %3 = arith.truncf %2 : vector<8x32xf32> to vector<8x32xbf16>
    %c0_3 = arith.constant 0 : index
    %c0_4 = arith.constant 0 : index
    %4 = vector.load %arg5[%c0_3, %c0_4] : memref<32x64xbf16, #tpu.memory_space<vmem>>, vector<32x64xbf16>
    %cst = arith.constant dense<0.000000e+00> : vector<8x64xf32>
    %5 = tpu.matmul %3, %4, %cst {dimension_numbers = #tpu.dot_dimension_numbers<[1], [0], [0], [1], [0, 0, 1, 1], [], []>} : vector<8x32xbf16>, vector<32x64xbf16>, vector<8x64xf32> -> vector<8x64xf32>
    %c0_i32 = arith.constant 0 : i32
    %6 = arith.cmpi eq, %arg2, %c0_i32 : i32
    %7 = arith.extui %6 : i1 to i32
    %c0_i32_5 = arith.constant 0 : i32
    %8 = arith.cmpi ne, %7, %c0_i32_5 : i32
    scf.if %8 {
      %c0_10 = arith.constant 0 : index
      %c0_11 = arith.constant 0 : index
      %15 = vector.load %arg7[%c0_10, %c0_11] : memref<8x64xf32, #tpu.memory_space<vmem>>, vector<8x64xf32>
      tpu.vector_store %arg7[%c0_10, %c0_11], %5 {strides = array<i32>} : memref<8x64xf32, #tpu.memory_space<vmem>>, vector<8x64xf32>,
    } else {
    }
    %c0_i32_6 = arith.constant 0 : i32
    %9 = arith.cmpi ne, %arg2, %c0_i32_6 : i32
    %10 = arith.extui %9 : i1 to i32
    %c0_i32_7 = arith.constant 0 : i32
    %11 = arith.cmpi ne, %10, %c0_i32_7 : i32
    scf.if %11 {
      %c0_10 = arith.constant 0 : index
      %c0_11 = arith.constant 0 : index
      %15 = vector.load %arg7[%c0_10, %c0_11] : memref<8x64xf32, #tpu.memory_space<vmem>>, vector<8x64xf32>
      %16 = arith.addf %15, %5 : vector<8x64xf32>
      %c0_12 = arith.constant 0 : index
      %c0_13 = arith.constant 0 : index
      %17 = vector.load %arg7[%c0_12, %c0_13] : memref<8x64xf32, #tpu.memory_space<vmem>>, vector<8x64xf32>
      tpu.vector_store %arg7[%c0_12, %c0_13], %16 {strides = array<i32>} : memref<8x64xf32, #tpu.memory_space<vmem>>, vector<8x64xf32>,
    } else {
    }
    %c0_i32_8 = arith.constant 0 : i32
    %12 = arith.cmpi eq, %arg2, %c0_i32_8 : i32
    %13 = arith.extui %12 : i1 to i32
    %c0_i32_9 = arith.constant 0 : i32
    %14 = arith.cmpi ne, %13, %c0_i32_9 : i32
    scf.if %14 {
      %c0_10 = arith.constant 0 : index
      %c0_11 = arith.constant 0 : index
      %15 = vector.load %arg7[%c0_10, %c0_11] : memref<8x64xf32, #tpu.memory_space<vmem>>, vector<8x64xf32>
      %c0_12 = arith.constant 0 : index
      %c0_13 = arith.constant 0 : index
      %16 = vector.load %arg6[%c0_12, %c0_13] : memref<8x64xf32, #tpu.memory_space<vmem>>, vector<8x64xf32>
      %17 = arith.mulf %15, %16 : vector<8x64xf32>
      %18 = math.tanh %17 : vector<8x64xf32>
      %c0_14 = arith.constant 0 : index
      %c0_15 = arith.constant 0 : index
      %19 = vector.load %arg7[%c0_14, %c0_15] : memref<8x64xf32, #tpu.memory_space<vmem>>, vector<8x64xf32>
      tpu.vector_store %arg7[%c0_14, %c0_15], %18 {strides = array<i32>} : memref<8x64xf32, #tpu.memory_space<vmem>>, vector<8x64xf32>,
    } else {
    }
    return
  }
  func.func @transform_0(%arg0: i32, %arg1: i32, %arg2: i32) -> (i32, i32) {
    %c0_i32 = arith.constant 0 : i32
    return %arg0, %arg2 : i32, i32
  }
  func.func @transform_1(%arg0: i32, %arg1: i32, %arg2: i32) -> (i32, i32) {
    %c0_i32 = arith.constant 0 : i32
    return %arg0, %arg2 : i32, i32
  }
  func.func @transform_2(%arg0: i32, %arg1: i32, %arg2: i32) -> (i32, i32) {
    %c0_i32 = arith.constant 0 : i32
    return %arg2, %arg1 : i32, i32
  }
  func.func @transform_3(%arg0: i32, %arg1: i32, %arg2: i32) -> (i32, i32) {
    %c0_i32 = arith.constant 0 : i32
    return %arg0, %arg1 : i32, i32
  }
  func.func @transform_4(%arg0: i32, %arg1: i32, %arg2: i32) -> (i32, i32) {
    %c0_i32 = arith.constant 0 : i32
    return %arg0, %arg1 : i32, i32
  }
}

</mosaic_0001>

<bundles_post_ra>
// kernel: tpu_custom_call.1
= control target key start
LH: loop header
LB: loop body
LE: loop exit
PB: predicated region body
PF: predicated region fallthrough
CT: control target
= control target key end

     0   :  { %9 = vsyncpa [#allocation3], 0  ;;  %s356_s0 = inlined_call_operand.hbm [shape: f32[8,32], index: 0, kind: input, shape index: {}]   ;;  %s357_s1 = inlined_call_operand.hbm [shape: f32[8,32], index: 1, kind: input, shape index: {}]   ;;  %s358_s2 = inlined_call_operand.hbm [shape: bf16[32,64], index: 2, kind: input, shape index: {}]   ;;  %s359_s3 = inlined_call_operand.hbm [shape: f32[8,64], index: 3, kind: input, shape index: {}]   ;;  %s360_s4 = inlined_call_operand.hbm [shape: f32[8,64], index: 4, kind: output, shape index: {}]  }
   0x1   :  { %10 = vsyncpa [#allocation6], 0 }
   0x2   :  { %11 = vsyncpa [#allocation9], 0 }
   0x3   :  { %12 = vsyncpa [#allocation4], 0  ;;  %s307_s15 = smov [#allocation5]   ;;  %s308_s17 = smov [#allocation2]  }
   0x4   :  { %s29_s16 = sshll.u32 %s307_s15, 4  ;;  %s19_s18 = sshll.u32 %s308_s17, 4  ;;  %s30_s16 = int_to_ptr.vmem [resolvable:$true] %s29_s16  ;;  %s20_s18 = int_to_ptr.vmem [resolvable:$true] %s19_s18 }
   0x5   :  { %s207_s19 = scalar_lea.vmem %s30_s16, 128  ;;  %p212_p1 = scmp.lt.s32.totalorder %s30_s16, %s30_s16 }
   0x6   :  { %p208_p0 = scmp.ne.s32.totalorder %s30_s16, %s207_s19  ;;  %p213_p2 = scmp.lt.s32.totalorder %s207_s19, %s207_s19 }
   0x8   :  { %p214_p3 = por %p213_p2, %p212_p1 }
   0xa   :  { %p215_p4 = pnand %p214_p3, %p208_p0 }
   0xc   :  { %218 = shalt.err (!%p215_p4)
}
   0xd   :  { %32 = dma.hbm_to_vmem [thread:$0]  %s357_s1, 128, %s30_s16, [#allocation6]  }
   0xe   :  { %s227_s22 = scalar_lea.vmem %s20_s18, 128  ;;  %p232_p6 = scmp.lt.s32.totalorder %s20_s18, %s20_s18 }
   0xf   :  { %p228_p5 = scmp.ne.s32.totalorder %s20_s18, %s227_s22  ;;  %p233_p7 = scmp.lt.s32.totalorder %s227_s22, %s227_s22 }
  0x11   :  { %p234_p8 = por %p233_p7, %p232_p6 }
  0x13   :  { %p235_p9 = pnand %p234_p8, %p228_p5 }
  0x15   :  { %238 = shalt.err (!%p235_p9)
}
  0x16   :  { %22 = dma.hbm_to_vmem [thread:$0]  %s356_s0, 128, %s20_s18, [#allocation3]  }
  0x17   :  { %s309_s25 = smov [#allocation7]  }
  0x18   :  { %s38_s26 = sshll.u32 %s309_s25, 4  ;;  %s39_s26 = int_to_ptr.vmem [resolvable:$true] %s38_s26 }
  0x19   :  { %s247_s27 = scalar_lea.vmem %s39_s26, 256  ;;  %p252_p11 = scmp.lt.s32.totalorder %s39_s26, %s39_s26 }
  0x1a   :  { %p248_p10 = scmp.ne.s32.totalorder %s39_s26, %s247_s27  ;;  %p253_p12 = scmp.lt.s32.totalorder %s247_s27, %s247_s27 }
  0x1c   :  { %p254_p13 = por %p253_p12, %p252_p11 }
  0x1e   :  { %p255_p0 = pnand %p254_p13, %p248_p10 }
  0x20   :  { %258 = shalt.err (!%p255_p0)
}
  0x21   :  { %s310_s1 = smov 64   ;;  %s311_s28 = smov 4  }
  0x22   :  { %44 = dma.hbm_to_vmem [thread:$0]  %s358_s2, 256, %s39_s26, [#allocation6], %s310_s1, %s310_s1, %s311_s28  }
  0x23   :  { %s312_s5 = smov [#allocation8]  }
  0x24   :  { %s51_s6 = sshll.u32 %s312_s5, 4  ;;  %s52_s6 = int_to_ptr.vmem [resolvable:$true] %s51_s6 }
  0x25   :  { %s267_s0 = scalar_lea.vmem %s52_s6, 128  ;;  %p272_p2 = scmp.lt.s32.totalorder %s52_s6, %s52_s6 }
  0x26   :  { %p268_p1 = scmp.ne.s32.totalorder %s52_s6, %s267_s0  ;;  %p273_p3 = scmp.lt.s32.totalorder %s267_s0, %s267_s0 }
  0x28   :  { %p274_p4 = por %p273_p3, %p272_p2 }
  0x2a   :  { %p275_p5 = pnand %p274_p4, %p268_p1 }
  0x2c   :  { %278 = shalt.err (!%p275_p5)
}
  0x2d   :  { %54 = dma.hbm_to_vmem [thread:$0]  %s359_s3, 128, %s52_s6, [#allocation9]  }
  0x2e   :  { %299 = dma.done.wait [#allocation3], 128  }
  0x2f   :  { %300 = vsyncadd [#allocation3], 4294967168 }
  0x30   :  { %301 = dma.done.wait [#allocation6], 384  }
  0x31   :  { %302 = vsyncadd [#allocation6], 4294966912 }
  0x32   :  { %303 = dma.done.wait [#allocation9], 128  }
  0x33   :  { %304 = vsyncadd [#allocation9], 4294967168  ;;  %v313_v0 = vmov 0.0   ;;  %vm314_vm0 = vmmov 0   ;;  %v195_v1 = vld [vmem:[#allocation7 + $0x8] sm:$0xff]   ;;  %v196_v2 = vld [vmem:[#allocation7] sm:$0xff]  }
  0x34   :  { %178 = vmatprep.subr.bf16.mxu0 %v313_v0  ;;  %182 = vmatprep.mubr.msk.bf16.mxu0 %vm314_vm0, %v313_v0  ;;  %v68_v3 = vld [vmem:[#allocation2] sm:$0xff]  ;;  %v69_v4 = vld [vmem:[#allocation5] sm:$0xff]  ;;  %vm88_vm1 = vcmask 261120   ;;  %vm136_vm2 = vcmask 523264   ;;  %s315_s2 = smov [#allocation10]  }
  0x35   :  { %179 = vmatpush3.bf16.msra.mxu0 %v195_v1  ;;  %v70_v5 = vmul.f32 %v69_v4, %v68_v3  ;;  %v150_v11 = vld [vmem:[#allocation8] sm:$0xff]  ;;  %s161_s3 = sshll.u32 %s315_s2, 4  ;;  %s162_s3 = int_to_ptr.vmem [resolvable:$true] %s161_s3 }
  0x36   :  { %180 = vmatprep.subr.bf16.mxu0 %v313_v0  ;;  %s279_s9 = scalar_lea.vmem %s162_s3, 128  ;;  %p284_p7 = scmp.lt.s32.totalorder %s162_s3, %s162_s3 }
  0x37   :  { %v71_v6 = vpack.c.bf16 %v70_v5, %v70_v5  ;;  %p280_p6 = scmp.ne.s32.totalorder %s162_s3, %s279_s9  ;;  %p285_p8 = scmp.lt.s32.totalorder %s279_s9, %s279_s9 }
  0x39   :  { %181 = vmatpush3.bf16.msra.mxu0 %v196_v2  ;;  %p286_p9 = por %p285_p8, %p284_p7 }
  0x3b   :  { %p287_p10 = pnand %p286_p9, %p280_p6 }
  0x3c   :  { %183 = vmatmul.mubr.msk.bf16.vlgmr.msra.gmra.mxu0 %vm88_vm1, %v71_v6 }
  0xfc   :  { %v126_v7 = vpop.f32.mrf.mxu0 }
  0xfd   :  { %137 = vst.msk [vmem:[#allocation10] sm:$0xff] %vm136_vm2, %v126_v7 }
  0xfe   :  { %v184_v8 = vpop.f32.mrf.mxu0 }
 0x100   :  { %v129_v9 = vpop.f32.mrf.mxu0 }
 0x102   :  { %v185_v10 = vpop.f32.mrf.mxu0 }
 0x104   :  { %v149_v12 = vld [vmem:[#allocation10] sm:$0xff] }
 0x105   :  { %v151_v13 = vmul.f32 %v150_v11, %v149_v12 }
 0x107   :  { %197 = vtanh.f32 %v151_v13 }
 0x114   :  { %v198_v14 = vpop.eup %197 }
 0x115   :  { %154 = vst.msk [vmem:[#allocation10] sm:$0xff] %vm136_vm2, %v198_v14 }
 0x116   :  { %290 = shalt.err (!%p287_p10)
}
 0x117   :  { %164 = dma.vmem_to_hbm [thread:$0]  %s162_s3, 128, %s360_s4, [#allocation4]  }
 0x118   :  { %305 = dma.done.wait [#allocation4], 128  }
 0x119   :  { %306 = vsyncadd [#allocation4], 4294967168 }
 0x11a   :  { %168 = vsyncpa [#allocation3], 1 }
 0x11b   :  { %169 = vsyncpa [#allocation6], 1 }
 0x11c   :  { %170 = vsyncpa [#allocation9], 1 }
 0x11d   :  { %171 = vsyncpa [#allocation4], 1 }

</bundles_post_ra>
